<compile_context>
chip_gen: v5e
topology: v5e:2x2
jax: 0.10.0
libtpu: 0.0.40
codegen_flags: <defaults>
</compile_context>

<pallas_src>
import functools

import jax
import jax.numpy as jnp
from jax.experimental import pallas as pl
from jax.experimental.pallas import tpu as pltpu

# Keep f32 matmul precision so in-kernel MXU dots and the pure-JAX reference
# agree to tight tolerances.
jax.config.update("jax_default_matmul_precision", "float32")


# ---------------------------------------------------------------------------
# Kernel 1: pointwise (kernel_size=1) Conv1d, optional fused alpha-sigmoid
# ---------------------------------------------------------------------------
def _pointwise_conv_kernel(x_ref, w_ref, b_ref, o_ref, *, alpha):
    # x_ref: (Cin, T), w_ref: (Cout, Cin), b_ref: (Cout, 1), o_ref: (Cout, T)
    x = x_ref[...].astype(jnp.float32)
    y = jnp.dot(w_ref[...], x, preferred_element_type=jnp.float32) + b_ref[...]
    if alpha is not None:
        y = 1.0 / (1.0 + jnp.exp(-alpha * y))
    o_ref[...] = y.astype(o_ref.dtype)


def pointwise_conv(x, w, b, *, alpha=None):
    """x: (B, Cin, T), w: (Cout, Cin), b: (Cout,) -> (B, Cout, T)."""
    B, Cin, T = x.shape
    Cout = w.shape[0]
    kernel = functools.partial(_pointwise_conv_kernel, alpha=alpha)
    return pl.pallas_call(
        kernel,
        out_shape=jax.ShapeDtypeStruct((B, Cout, T), x.dtype),
        grid=(B,),
        in_specs=[
            pl.BlockSpec((None, Cin, T), lambda i: (i, 0, 0)),
            pl.BlockSpec((Cout, Cin), lambda i: (0, 0)),
            pl.BlockSpec((Cout, 1), lambda i: (0, 0)),
        ],
        out_specs=pl.BlockSpec((None, Cout, T), lambda i: (i, 0, 0)),
        compiler_params=pltpu.CompilerParams(dimension_semantics=("parallel",)),
    )(x, w, b.reshape(Cout, 1))


# ---------------------------------------------------------------------------
# Kernel 2: ConvBlock = Conv1d(k=3, pad=1) + BatchNorm1d(eval) + LeakyReLU + residual
# ---------------------------------------------------------------------------
def _conv_block_kernel(xp_ref, w_ref, b_ref, scale_ref, shift_ref, o_ref, *, t, slope):
    # xp_ref: (Ch, T+2) zero-padded input; w_ref: (3, Ch, Ch);
    # b_ref / scale_ref / shift_ref: (Ch, 1); o_ref: (Ch, T)
    xp = xp_ref[...].astype(jnp.float32)
    x = xp[:, 1:t + 1]  # un-padded input for the residual
    y = jnp.dot(w_ref[0], xp[:, 0:t], preferred_element_type=jnp.float32)
    y = y + jnp.dot(w_ref[1], xp[:, 1:t + 1], preferred_element_type=jnp.float32)
    y = y + jnp.dot(w_ref[2], xp[:, 2:t + 2], preferred_element_type=jnp.float32)
    y = y + b_ref[...]
    y = y * scale_ref[...] + shift_ref[...]        # BatchNorm1d (inference)
    y = jnp.where(y > 0, y, slope * y)             # LeakyReLU
    o_ref[...] = (x + y).astype(o_ref.dtype)       # residual


def conv_block(x, w, b, gamma, beta, running_mean, running_var,
               *, bn_eps=1e-5, negative_slope=0.01):
    """x: (B, Ch, T); w: (3, Ch, Ch) with w[k] = torch_weight[:, :, k]."""
    B, Ch, T = x.shape
    xp = jnp.pad(x, ((0, 0), (0, 0), (1, 1)))
    scale = gamma * jax.lax.rsqrt(running_var + bn_eps)
    shift = beta - running_mean * scale
    kernel = functools.partial(_conv_block_kernel, t=T, slope=negative_slope)
    return pl.pallas_call(
        kernel,
        out_shape=jax.ShapeDtypeStruct((B, Ch, T), x.dtype),
        grid=(B,),
        in_specs=[
            pl.BlockSpec((None, Ch, T + 2), lambda i: (i, 0, 0)),
            pl.BlockSpec((3, Ch, Ch), lambda i: (0, 0, 0)),
            pl.BlockSpec((Ch, 1), lambda i: (0, 0)),
            pl.BlockSpec((Ch, 1), lambda i: (0, 0)),
            pl.BlockSpec((Ch, 1), lambda i: (0, 0)),
        ],
        out_specs=pl.BlockSpec((None, Ch, T), lambda i: (i, 0, 0)),
        compiler_params=pltpu.CompilerParams(dimension_semantics=("parallel",)),
    )(xp, w, b.reshape(Ch, 1), scale.reshape(Ch, 1), shift.reshape(Ch, 1))


# ---------------------------------------------------------------------------
# Kernel 3: InstanceNorm (returns y, mean, std) — flattened, row-batched, fused
# ---------------------------------------------------------------------------
def _instance_norm_kernel(x_ref, y_ref, mn_ref, sd_ref, *, eps, n):
    # x_ref / y_ref: (rows, n); mn_ref / sd_ref: (rows, 1)
    x = x_ref[...].astype(jnp.float32)
    s = jnp.sum(x, axis=-1, keepdims=True)
    ss = jnp.sum(x * x, axis=-1, keepdims=True)
    mean = s * (1.0 / n)
    # unbiased variance (torch .var(-1) default), fused single pass in f32
    var = jnp.maximum(ss - s * mean, 0.0) * (1.0 / max(n - 1, 1))
    std = jnp.sqrt(var + eps)
    inv_std = jax.lax.rsqrt(var + eps)            # EUP, multiply instead of divide
    y_ref[...] = ((x - mean) * inv_std).astype(y_ref.dtype)
    mn_ref[...] = mean.astype(mn_ref.dtype)
    sd_ref[...] = std.astype(sd_ref.dtype)


def instance_norm(x, eps=1e-5, *, rows_per_step=None):
    """x: (B, C, *spatial) -> (y, mean, std); mean/std shaped (B, C, 1, ...)."""
    B, C = x.shape[:2]
    spatial = x.shape[2:]
    n = 1
    for d in spatial:
        n *= d
    R = B * C
    x2 = x.reshape(R, n)

    if rows_per_step is None:
        # ~2 MiB f32 input tile -> (in+out) double-buffered stays far below the
        # scoped-VMEM default on v5e/v6e/v7x.
        budget_elems = (2 * 1024 * 1024) // 4
        rows_per_step = min(1024, max(8, (budget_elems // max(n, 1)) // 8 * 8))
    rows = R if rows_per_step >= R else rows_per_step  # multiple of 8 when < R
    grid = (pl.cdiv(R, rows),)

    kernel = functools.partial(_instance_norm_kernel, eps=eps, n=n)
    y2, mn, sd = pl.pallas_call(
        kernel,
        out_shape=(
            jax.ShapeDtypeStruct((R, n), x.dtype),
            jax.ShapeDtypeStruct((R, 1), x.dtype),
            jax.ShapeDtypeStruct((R, 1), x.dtype),
        ),
        grid=grid,
        in_specs=[pl.BlockSpec((rows, n), lambda i: (i, 0))],
        out_specs=(
            pl.BlockSpec((rows, n), lambda i: (i, 0)),
            pl.BlockSpec((rows, 1), lambda i: (i, 0)),
            pl.BlockSpec((rows, 1), lambda i: (i, 0)),
        ),
        compiler_params=pltpu.CompilerParams(dimension_semantics=("parallel",)),
    )(x2)

    stat_shape = (B, C) + (1,) * len(spatial)
    return y2.reshape(x.shape), mn.reshape(stat_shape), sd.reshape(stat_shape)


# ---------------------------------------------------------------------------
# Encoder forward (Pallas) and pure-JAX reference
# ---------------------------------------------------------------------------
def encoder_forward(x, params, *, alpha=0.1):
    y = pointwise_conv(x, params["w_in"], params["b_in"])
    mns, sds = [], []
    for blk in params["blocks"]:
        y = conv_block(y, blk["w"], blk["b"], blk["gamma"], blk["beta"],
                       blk["running_mean"], blk["running_var"])
        y, mn, sd = instance_norm(y)
        mns.append(mn)
        sds.append(sd)
    y = pointwise_conv(y, params["w_out"], params["b_out"], alpha=alpha)
    return y, mns, sds


def _pointwise_ref(x, w, b):
    return jnp.einsum("oc,bct->bot", w, x) + b[None, :, None]


def _conv_block_ref(x, blk, bn_eps=1e-5, slope=0.01):
    B, Ch, T = x.shape
    xp = jnp.pad(x, ((0, 0), (0, 0), (1, 1)))
    y = sum(jnp.einsum("oc,bct->bot", blk["w"][k], xp[:, :, k:k + T]) for k in range(3))
    y = y + blk["b"][None, :, None]
    scale = blk["gamma"] * jax.lax.rsqrt(blk["running_var"] + bn_eps)
    shift = blk["beta"] - blk["running_mean"] * scale
    y = y * scale[None, :, None] + shift[None, :, None]
    y = jnp.where(y > 0, y, slope * y)
    return x + y


def _instance_norm_ref(x, eps=1e-5):
    B, C = x.shape[:2]
    flat = x.reshape(B, C, -1)
    mn = flat.mean(-1)
    var = flat.var(-1, ddof=1)
    sd = jnp.sqrt(var + eps)
    shape = (B, C) + (1,) * (x.ndim - 2)
    mn = mn.reshape(shape)
    sd = sd.reshape(shape)
    return (x - mn) / sd, mn, sd


def encoder_ref(x, params, *, alpha=0.1):
    y = _pointwise_ref(x, params["w_in"], params["b_in"])
    mns, sds = [], []
    for blk in params["blocks"]:
        y = _conv_block_ref(y, blk)
        y, mn, sd = _instance_norm_ref(y)
        mns.append(mn)
        sds.append(sd)
    y = _pointwise_ref(y, params["w_out"], params["b_out"])
    y = 1.0 / (1.0 + jnp.exp(-alpha * y))
    return y, mns, sds


def init_encoder_params(key, c_in, c_out, n_blocks, c_h):
    keys = jax.random.split(key, 4 + 2 * n_blocks)

    def u(k, shape, fan_in):
        lim = 1.0 / (fan_in ** 0.5)
        return jax.random.uniform(k, shape, jnp.float32, -lim, lim)

    params = {
        "w_in": u(keys[0], (c_h, c_in), c_in),
        "b_in": u(keys[1], (c_h,), c_in),
        "w_out": u(keys[2], (c_out, c_h), c_h),
        "b_out": u(keys[3], (c_out,), c_h),
        "blocks": [],
    }
    for i in range(n_blocks):
        kw, kb = keys[4 + 2 * i], keys[5 + 2 * i]
        params["blocks"].append({
            "w": u(kw, (3, c_h, c_h), 3 * c_h),      # w[k] == torch weight[:, :, k]
            "b": u(kb, (c_h,), 3 * c_h),
            "gamma": jnp.ones((c_h,), jnp.float32),
            "beta": jnp.zeros((c_h,), jnp.float32),
            "running_mean": jnp.zeros((c_h,), jnp.float32),
            "running_var": jnp.ones((c_h,), jnp.float32),
        })
    return params


if __name__ == "__main__":
    key = jax.random.PRNGKey(0)
    B, c_in, c_out, c_h, T, n_blocks = 2, 8, 8, 32, 128, 2

    k_x, k_p = jax.random.split(key)
    x = jax.random.normal(k_x, (B, c_in, T), dtype=jnp.float32)
    params = init_encoder_params(k_p, c_in, c_out, n_blocks, c_h)

    y, mns, sds = encoder_forward(x, params)
    y = jax.block_until_ready(y)

    y_ref, mns_ref, sds_ref = encoder_ref(x, params)

    assert y.shape == (B, c_out, T)
    assert jnp.allclose(y, y_ref, atol=1e-3, rtol=1e-3), float(jnp.max(jnp.abs(y - y_ref)))
    for got, ref in zip(mns, mns_ref):
        assert got.shape == (B, c_h, 1)
        assert jnp.allclose(got, ref, atol=1e-3, rtol=1e-3), float(jnp.max(jnp.abs(got - ref)))
    for got, ref in zip(sds, sds_ref):
        assert got.shape == (B, c_h, 1)
        assert jnp.allclose(got, ref, atol=1e-3, rtol=1e-3), float(jnp.max(jnp.abs(got - ref)))

    print("KERNEL_OK")
</pallas_src>

<mosaic_0001>
module attributes {stable_mosaic.version = 11 : i64} {
  func.func @_pointwise_conv_kernel(%arg0: i32, %arg1: memref<1x8x128xf32, #tpu.memory_space<vmem>>, %arg2: memref<32x8xf32, #tpu.memory_space<vmem>>, %arg3: memref<32x1xf32, #tpu.memory_space<vmem>>, %arg4: memref<1x32x128xf32, #tpu.memory_space<vmem>>) attributes {dimension_semantics = [#tpu.dimension_semantics<parallel>], iteration_bounds = array<i64: 2>, scalar_prefetch = 0 : i64, scratch_operands = 0 : i64, tpu.core_type = #tpu.core_type<tc>, window_params = [{transform_indices = @transform_0, window_bounds = array<i64: 1, 8, 128>}, {pipeline_mode = #tpu.pipeline_mode<synchronous>, transform_indices = @transform_1, window_bounds = array<i64: 32, 8>}, {pipeline_mode = #tpu.pipeline_mode<synchronous>, transform_indices = @transform_2, window_bounds = array<i64: 32, 1>}, {transform_indices = @transform_3, window_bounds = array<i64: 1, 32, 128>}]} {
    %c0 = arith.constant 0 : index
    %c0_0 = arith.constant 0 : index
    %c0_1 = arith.constant 0 : index
    %0 = vector.load %arg1[%c0, %c0_0, %c0_1] : memref<1x8x128xf32, #tpu.memory_space<vmem>>, vector<1x8x128xf32>
    %1 = vector.shape_cast %0 : vector<1x8x128xf32> to vector<8x128xf32>
    %c0_2 = arith.constant 0 : index
    %c0_3 = arith.constant 0 : index
    %2 = vector.load %arg2[%c0_2, %c0_3] : memref<32x8xf32, #tpu.memory_space<vmem>>, vector<32x8xf32>
    %cst = arith.constant dense<0.000000e+00> : vector<32x128xf32>
    %3 = tpu.matmul %2, %1, %cst {dimension_numbers = #tpu.dot_dimension_numbers<[1], [0], [0], [1], [0, 0, 1, 1], [], []>, precision = #tpu.contract_precision<fp32>} : vector<32x8xf32>, vector<8x128xf32>, vector<32x128xf32> -> vector<32x128xf32>
    %c0_4 = arith.constant 0 : index
    %c0_5 = arith.constant 0 : index
    %4 = vector.load %arg3[%c0_4, %c0_5] : memref<32x1xf32, #tpu.memory_space<vmem>>, vector<32x1xf32>
    %5 = vector.broadcast %4 : vector<32x1xf32> to vector<32x128xf32>
    %6 = arith.addf %3, %5 : vector<32x128xf32>
    %c0_6 = arith.constant 0 : index
    %c0_7 = arith.constant 0 : index
    %c0_8 = arith.constant 0 : index
    %7 = vector.load %arg4[%c0_6, %c0_7, %c0_8] : memref<1x32x128xf32, #tpu.memory_space<vmem>>, vector<1x32x128xf32>
    %8 = vector.shape_cast %7 : vector<1x32x128xf32> to vector<32x128xf32>
    %9 = vector.shape_cast %6 : vector<32x128xf32> to vector<1x32x128xf32>
    tpu.vector_store %arg4[%c0_6, %c0_7, %c0_8], %9 {strides = array<i32>} : memref<1x32x128xf32, #tpu.memory_space<vmem>>, vector<1x32x128xf32>,
    return
  }
  func.func @transform_0(%arg0: i32) -> (i32, i32, i32) {
    %c0_i32 = arith.constant 0 : i32
    %c0_i32_0 = arith.constant 0 : i32
    %c0_i32_1 = arith.constant 0 : i32
    return %arg0, %c0_i32, %c0_i32_0 : i32, i32, i32
  }
  func.func @transform_1(%arg0: i32) -> (i32, i32) {
    %c0_i32 = arith.constant 0 : i32
    %c0_i32_0 = arith.constant 0 : i32
    %c0_i32_1 = arith.constant 0 : i32
    return %c0_i32, %c0_i32_0 : i32, i32
  }
  func.func @transform_2(%arg0: i32) -> (i32, i32) {
    %c0_i32 = arith.constant 0 : i32
    %c0_i32_0 = arith.constant 0 : i32
    %c0_i32_1 = arith.constant 0 : i32
    return %c0_i32, %c0_i32_0 : i32, i32
  }
  func.func @transform_3(%arg0: i32) -> (i32, i32, i32) {
    %c0_i32 = arith.constant 0 : i32
    %c0_i32_0 = arith.constant 0 : i32
    %c0_i32_1 = arith.constant 0 : i32
    return %arg0, %c0_i32, %c0_i32_0 : i32, i32, i32
  }
}

</mosaic_0001>

<bundles_post_ra>
// kernel: tpu_custom_call.1
= control target key start
LH: loop header
LB: loop body
LE: loop exit
PB: predicated region body
PF: predicated region fallthrough
CT: control target
= control target key end

     0   :  { %8 = vsyncpa [#allocation3], 0  ;;  %s804_s0 = inlined_call_operand.vmem [shape: f32[2,8,128], index: 0, kind: input, shape index: {}]   ;;  %s805_s1 = inlined_call_operand.vmem [shape: f32[32,8], index: 1, kind: input, shape index: {}]   ;;  %s806_s2 = inlined_call_operand.vmem [shape: f32[32,1], index: 2, kind: input, shape index: {}]   ;;  %s807_s3 = inlined_call_operand.hbm [shape: f32[2,32,128], index: 3, kind: output, shape index: {}]  }
   0x1   :  { %10 = vsyncpa [#allocation3 + $0x1], 0  ;;  %s674_s12 = smov 0   ;;  %s676_s13 = smov 0  }
   0x2   :  { %s678_s14 = smov 0   ;;  %s680_s15 = smov 0  }
   0x3 LB: > { %s695_s16 = sadd.s32 4294967295, %s649_s15   ;;  %s529_s17 = sadd.s32 4294967294, %s649_s15   ;;  %s649_s15 = sphi %s680_s15, %s813_s15   ;;  %s645_s14 = sphi %s678_s14, %s812_s14   ;;  %s641_s13 = sphi %s676_s13, %s811_s13   ;;  %s637_s12 = sphi %s674_s12, %s810_s12  }
   0x4   : > { %s699_s18 = sadd.s32 1, %s649_s15   ;;  %s91_s19 = sadd.s32 1, %s645_s14 }
   0x5   : > { %s88_s20 = ssub.s32 %s649_s15, %s699_s18  ;;  %p101_p0 = scmp.ne.s32.totalorder %s645_s14, %s641_s13 }
   0x6   : > { %p89_p1 = scmp.eq.s32.totalorder %s88_s20, 0  ;;  %p102_p2 = scmp.eq.s32.totalorder %s695_s16, 1 }
   0x7   : > { %p107_p3 = scmp.ne.s32.totalorder %s641_s13, %s637_s12  ;;  %p108_p4 = scmp.eq.s32.totalorder %s529_s17, 1 }
   0x8   : > { %s710_s21 = scalar_select %p89_p1, %s645_s14, %s91_s19  }
   0x9   : > { %p712_p5 = por %p102_p2, %p101_p0  ;;  %p716_p6 = por %p108_p4, %p107_p3 }
   0xa   : > { %p532_p7 = scmp.ge.s32.totalorder %s649_s15, 1  ;;  %p139_p8 = scmp.lt.s32.totalorder %s649_s15, 3 }
   0xc   : > { %p140_p9 = pnand %p532_p7, %p139_p8 }
   0xd   : > { %p162_p10 = scmp.lt.s32.totalorder (!%p140_p9), %s695_s16, 1  ;;  %s159_s27 = sand.u32 (!%p140_p9), 1, %s641_s13  }
   0xe   : > { %143 = sbr.rel (%p140_p9) target bundleno = 217 (0xd9), region = 32  ;;  %s533_s28 = sshll.u32 (!%p140_p9), %s159_s27, 5 }
   0xf   : > { %s764_s29 = scalar_lea.vmem (!%p140_p9), [#allocation2], %s533_s28  ;;  %s540_s30 = sshll.u32 (!%p140_p9), %s695_s16, 5 }
  0x10   : > { %s463_s6 = scalar_lea.hbm (!%p140_p9), %s807_s3, %s540_s30 }
  0x13   : > { %v169_v0 = vld [vmem:[%s805_s1 + $0x10] sm:$0xff]  ;;  %vm195_vm0 = vcmask 64512   ;;  %v170_v1 = vld [vmem:[%s805_s1 + $0x18] sm:$0xff]  ;;  %v167_v2 = vld [vmem:[%s805_s1] sm:$0xff]  ;;  %v651_v6 = vmov 0   ;;  %s163_s7 = scalar_select %p162_p10, %s695_s16, 1 }
  0x14   : > { %v203_v3 = vsel %vm195_vm0, %v169_v0, 0  ;;  %v206_v4 = vsel %vm195_vm0, %v170_v1, 0  ;;  %v197_v5 = vsel %vm195_vm0, %v167_v2, 0  ;;  %586 = vset.pattern.permute.xlu1 %v651_v6  ;;  %v173_v7 = vld [vmem:[%s806_s2 + $0x10] sm:$0xff]  ;;  %v168_v8 = vld [vmem:[%s805_s1 + $0x8] sm:$0xff]  ;;  %585 = vset.pattern.permute.xlu0 %v651_v6  ;;  %v171_v17 = vld [vmem:[%s806_s2] sm:$0xff] }
  0x15   : > { %v241_v9 = vand.u32 4294901760, %v203_v3  ;;  %v742_v10 = vand.u32 4294901760, %v206_v4  ;;  %v225_v11 = vand.u32 4294901760, %v197_v5  ;;  %187 = vperm.xlu1 %586, %v173_v7   ;;  %v200_v12 = vsel %vm195_vm0, %v168_v8, 0  ;;  %s534_s8 = sshll.u32 %s163_s7, 3  ;;  %177 = vperm.xlu0 %585, %v171_v17   ;;  %v174_v23 = vld [vmem:[%s806_s2 + $0x18] sm:$0xff] }
  0x16   : > { %v233_v13 = vand.u32 4294901760, %v200_v12  ;;  %s165_s19 = scalar_lea.vmem %s804_s0, %s534_s8  ;;  %v172_v34 = vld [vmem:[%s806_s2 + $0x8] sm:$0xff]  ;;  %s464_s7 = sshll.u32 %s764_s29, 4  ;;  %s465_s7 = int_to_ptr.vmem [resolvable:$true] %s464_s7 }
  0x17   : > { %v242_v14 = vsub.f32 %v203_v3, %v241_v9  ;;  %v250_v15 = vsub.f32 %v206_v4, %v742_v10  ;;  %v226_v16 = vsub.f32 %v197_v5, %v225_v11  ;;  %v166_v19 = vld [vmem:[%s165_s19] sm:$0xff]  ;;  %s466_s8 = sshll.u32 %s463_s6, 4  ;;  %s452_s16 = scalar_lea.sflag [#allocation3], %s159_s27  ;;  %s467_s8 = int_to_ptr.hbm [resolvable:$true] %s466_s8 }
  0x18   : > { %v234_v18 = vsub.f32 %v200_v12, %v233_v13  ;;  %v223_v22 = vand.u32 4294901760, %v166_v19  ;;  %s601_s9 = sshra.s32 %s467_s8, 4  ;;  %s607_s19 = scalar_lea.hbm %s807_s3, 64  ;;  %s602_s9 = int_to_ptr.hbm [resolvable:$true] %s601_s9 }
  0x19   : > { %v243_v20 = vand.u32 4294901760, %v242_v14  ;;  %v227_v21 = vand.u32 4294901760, %v226_v16  ;;  %v251_v25 = vand.u32 4294901760, %v250_v15  ;;  %s603_s10 = scalar_lea.hbm %s602_s9, 32  ;;  %p608_p0 = scmp.lt.s32.totalorder %s602_s9, %s807_s3 }
  0x1a   : > { %v235_v27 = vand.u32 4294901760, %v234_v18  ;;  %541 = vmatpush.msra.mxu2 %v223_v22  ;;  %v274_v28 = vsub.f32 %v166_v19, %v223_v22  ;;  %224 = vmatpush.msra.mxu0 %v223_v22  ;;  %p604_p11 = scmp.ne.s32.totalorder %s602_s9, %s603_s10  ;;  %p609_p1 = scmp.lt.s32.totalorder %s607_s19, %s603_s10 }
  0x1b   : > { %v244_v24 = vsub.f32 %v242_v14, %v243_v20  ;;  %v228_v26 = vsub.f32 %v226_v16, %v227_v21  ;;  %v252_v32 = vsub.f32 %v250_v15, %v251_v25 }
  0x1c   : > { %313 = vmatpush.msrb.mxu2 %v274_v28  ;;  %v275_v31 = vand.u32 4294901760, %v274_v28  ;;  %v236_v33 = vsub.f32 %v234_v18, %v235_v27  ;;  %p605_p12 = pnand %p604_p11, %p712_p5  ;;  %p610_p2 = por %p609_p1, %p608_p0 }
  0x1d   : > { %v245_v29 = vand.u32 4294901760, %v244_v24  ;;  %v229_v30 = vand.u32 4294901760, %v228_v26  ;;  %192 = vperm.xlu1 %586, %v174_v23   ;;  %182 = vperm.xlu0 %585, %v172_v34   ;;  %v253_v37 = vand.u32 4294901760, %v252_v32 }
  0x1e   : > { %v276_v35 = vsub.f32 %v274_v28, %v275_v31  ;;  %395 = vmatpush.msrb.mxu0 %v275_v31  ;;  %v237_v38 = vand.u32 4294901760, %v236_v33  ;;  %p606_p13 = pneg %p605_p12 }
  0x1f   : > { %246 = vmatmul.f32.vlgmr.msra.gmra.mxu2 %v245_v29  ;;  %230 = vmatmul.f32.vlgmr.msra.gmra.mxu0 %v229_v30 }
  0x20   : > { %v277_v36 = vand.u32 4294901760, %v276_v35  ;;  %p611_p3 = pnand %p610_p2, %p606_p13 }
  0x22   : > { %542 = vmatpush.msra.mxu3 %v277_v36  ;;  %278 = vmatpush.msra.mxu1 %v277_v36 }
  0x23   : > { %288 = vmatmul.f32.vlgmr.msra.gmra.mxu3 %v241_v9  ;;  %280 = vmatmul.f32.vlgmr.msra.gmra.mxu1 %v225_v11 }
  0x24   : > { %351 = vmatpush.msrb.mxu3 %v223_v22  ;;  %429 = vmatpush.msrb.mxu1 %v223_v22 }
  0x27   : > { %254 = vmatmul.f32.gmra.mxu2 %v253_v37  ;;  %238 = vmatmul.f32.gmra.mxu0 %v237_v38 }
  0x2b   : > { %292 = vmatmul.f32.gmra.mxu3 %v742_v10  ;;  %284 = vmatmul.f32.gmra.mxu1 %v233_v13 }
  0x2f   : > { %316 = vmatmul.f32.vlgmr.msrb.gmra.mxu2 %v226_v16  ;;  %397 = vmatmul.f32.vlgmr.msrb.gmra.mxu0 %v225_v11 }
  0x33   : > { %355 = vmatmul.f32.vlgmr.msrb.gmra.mxu3 %v227_v21  ;;  %431 = vmatmul.f32.vlgmr.msrb.gmra.mxu1 %v225_v11 }
  0x37   : > { %321 = vmatmul.f32.gmra.mxu2 %v234_v18  ;;  %401 = vmatmul.f32.gmra.mxu0 %v233_v13 }
  0x3b   : > { %361 = vmatmul.f32.gmra.mxu3 %v235_v27  ;;  %435 = vmatmul.f32.gmra.mxu1 %v233_v13 }
  0x3f   : > { %326 = vmatmul.f32.gmra.mxu2 %v242_v14  ;;  %405 = vmatmul.f32.gmra.mxu0 %v241_v9 }
  0x43   : > { %367 = vmatmul.f32.gmra.mxu3 %v243_v20  ;;  %439 = vmatmul.f32.gmra.mxu1 %v241_v9 }
  0x47   : > { %331 = vmatmul.f32.gmra.mxu2 %v250_v15  ;;  %409 = vmatmul.f32.gmra.mxu0 %v742_v10 }
  0x4b   : > { %373 = vmatmul.f32.gmra.mxu3 %v251_v25  ;;  %443 = vmatmul.f32.gmra.mxu1 %v742_v10 }
  0x87   : > { %v178_v46 = vpop.permute.xlu0 %177  ;;  %v188_v60 = vpop.permute.xlu1 %187 }
  0x8f   : > { %v183_v53 = vpop.permute.xlu0 %182  ;;  %v193_v9 = vpop.permute.xlu1 %192 }
  0x9c   : > { %v231_v39 = vpop.f32.mrf.mxu0 }
  0x9d   : > { %v232_v48 = vadd.f32 %v231_v39, %v178_v46 }
  0xa0   : > { %v281_v41 = vpop.f32.mrf.mxu1 }
  0xa1   : > { %v282_v52 = vadd.f32 %v281_v41, %v232_v48 }
  0xa2   : > { %v247_v40 = vpop.f32.mrf.mxu2 }
  0xa3   : > { %v248_v3 = vadd.f32 %v247_v40, %v188_v60 }
  0xa4   : > { %v239_v43 = vpop.f32.mrf.mxu0 }
  0xa5   : > { %v240_v56 = vadd.f32 %v239_v43, %v183_v53 }
  0xa6   : > { %v289_v42 = vpop.f32.mrf.mxu3 }
  0xa7   : > { %v290_v7 = vadd.f32 %v289_v42, %v248_v3 }
  0xa8   : > { %v285_v45 = vpop.f32.mrf.mxu1 }
  0xa9   : > { %v286_v62 = vadd.f32 %v285_v45, %v240_v56 }
  0xaa   : > { %v255_v44 = vpop.f32.mrf.mxu2 }
  0xab   : > { %v256_v14 = vadd.f32 %v255_v44, %v193_v9 }
  0xac   : > { %v398_v50 = vpop.f32.mrf.mxu0 }
  0xae   : > { %v293_v47 = vpop.f32.mrf.mxu3 }
  0xaf   : > { %v294_v18 = vadd.f32 %v293_v47, %v256_v14 }
  0xb0   : > { %v432_v51 = vpop.f32.mrf.mxu1 }
  0xb2   : > { %v317_v49 = vpop.f32.mrf.mxu2 }
  0xb3   : > { %v318_v54 = vadd.f32 %v317_v49, %v282_v52 }
  0xb4   : > { %v402_v61 = vpop.f32.mrf.mxu0 }
  0xb6   : > { %v356_v55 = vpop.f32.mrf.mxu3 }
  0xb7   : > { %v357_v57 = vadd.f32 %v356_v55, %v318_v54 }
  0xb8   : > { %v436_v0 = vpop.f32.mrf.mxu1 }
  0xb9   : > { %v399_v59 = vadd.f32 %v398_v50, %v357_v57 }
  0xba   : > { %v322_v58 = vpop.f32.mrf.mxu2 }
  0xbb   : > { %v433_v63 = vadd.f32 %v432_v51, %v399_v59  ;;  %v323_v1 = vadd.f32 %v322_v58, %v286_v62 }
  0xbc   : > { %v406_v10 = vpop.f32.mrf.mxu0 }
  0xbd   : > { %447 = vst [vmem:[%s764_s29] sm:$0xff] %v433_v63 }
  0xbe   : > { %v362_v2 = vpop.f32.mrf.mxu3 }
  0xbf   : > { %v363_v4 = vadd.f32 %v362_v2, %v323_v1 }
  0xc0   : > { %v440_v13 = vpop.f32.mrf.mxu1 }
  0xc1   : > { %v403_v6 = vadd.f32 %v402_v61, %v363_v4 }
  0xc2   : > { %v327_v5 = vpop.f32.mrf.mxu2 }
  0xc3   : > { %v437_v8 = vadd.f32 %v436_v0, %v403_v6  ;;  %v328_v11 = vadd.f32 %v327_v5, %v290_v7 }
  0xc4   : > { %v410_v22 = vpop.f32.mrf.mxu0 }
  0xc5   : > { %448 = vst [vmem:[%s764_s29 + $0x8] sm:$0xff] %v437_v8 }
  0xc6   : > { %v368_v12 = vpop.f32.mrf.mxu3 }
  0xc7   : > { %v369_v15 = vadd.f32 %v368_v12, %v328_v11 }
  0xc8   : > { %v444_v24 = vpop.f32.mrf.mxu1 }
  0xc9   : > { %v407_v16 = vadd.f32 %v406_v10, %v369_v15 }
  0xca   : > { %v332_v17 = vpop.f32.mrf.mxu2 }
  0xcb   : > { %v441_v19 = vadd.f32 %v440_v13, %v407_v16  ;;  %v333_v20 = vadd.f32 %v332_v17, %v294_v18 }
  0xcd   : > { %449 = vst [vmem:[%s764_s29 + $0x10] sm:$0xff] %v441_v19 }
  0xce   : > { %v374_v21 = vpop.f32.mrf.mxu3 }
  0xcf   : > { %v375_v23 = vadd.f32 %v374_v21, %v333_v20 }
  0xd1   : > { %v411_v25 = vadd.f32 %v410_v22, %v375_v23 }
  0xd3   : > { %v445_v26 = vadd.f32 %v444_v24, %v411_v25 }
  0xd5   : > { %450 = vst [vmem:[%s764_s29 + $0x18] sm:$0xff] %v445_v26 }
  0xd6   : > { %614 = shalt.err (!%p611_p3)
}
  0xd7   : > { %s652_s25 = smov 128   ;;  %s653_s26 = smov 8  }
  0xd8   : > { %543 = dma.vmem_to_hbm [thread:$0]  (%p712_p5), %s465_s7, 512, %s467_s8, %s452_s16, %s652_s25, %s652_s25, %s653_s26  }
  0xd9 PF: > { %p549_p4 = scmp.ge.s32.totalorder %s649_s15, 2  ;;  %s481_s27 = sand.u32 1, %s637_s12  }
  0xda   : > { %s482_s28 = scalar_lea.sflag [#allocation3], %s481_s27 }
  0xdb   : > { %p546_p7 = pnand %p549_p4, %p716_p6 }
  0xdd   : > { %p547_p8 = pneg %p546_p7 }
  0xdf   : > { %632 = dma.done.wait (%p547_p8), %s482_s28, 512  }
  0xe0   : > { %634 = vsyncadd (%p547_p8), %s482_s28, 4294966784  ;;  %p13_p9 = scmp.ge.s32.totalorder %s699_s18, 4   ;;  %s810_s12 = smov %s641_s13 }
  0xe1   : > { %s811_s13 = smov %s645_s14  ;;  %s812_s14 = smov %s710_s21 }
  0xe2   : > { %s813_s15 = smov %s699_s18  ;;  %15 = sbr.rel (!%p13_p9) target bundleno = 3 (0x3), region = 67 }
  0xe7   :  { %488 = vsyncpa [#allocation3], 1 }
  0xe8   :  { %490 = vsyncpa [#allocation3 + $0x1], 1 }

</bundles_post_ra>
